<compile_context>
chip_gen: v7x
topology: tpu7x:2x2x1
jax: 0.10.0
libtpu: 0.0.40
codegen_flags: <defaults>
</compile_context>

<pallas_src>
import functools
import math

import jax
import jax.numpy as jnp
from jax.experimental import pallas as pl
from jax.experimental.pallas import tpu as pltpu


def _round_up(v, m):
    return (v + m - 1) // m * m


def autoencoder_kernel(x_ref, noise_ref,
                       w1_ref, b1_ref, w2_ref, b2_ref,
                       w3_ref, b3_ref, w4_ref, b4_ref,
                       out_ref, *, noise_scale):
    """One [tb, in_dim] batch tile, natural layout end-to-end (no transposes).

    Weights are pre-transposed to [in, out]; biases are [1, out]."""
    x = x_ref[...]                                               # [tb, in_dim] f32

    # ---- encoder: h1 = relu(x @ W1t + b1) ; z = h1 @ W2t + b2 ----
    h1 = jnp.dot(x, w1_ref[...], preferred_element_type=jnp.float32) + b1_ref[...]
    h1 = jnp.maximum(h1, 0.0)
    z = jnp.dot(h1, w2_ref[...], preferred_element_type=jnp.float32) + b2_ref[...]
    # [tb, n_pad]; the padded latent columns are exactly zero (zero W2t cols / b2).

    # ---- AWGN: per-sample L2 normalize over the feature axis, add Gaussian noise ----
    # F.normalize(z, dim=1): z / max(||z||, 1e-12)  ==  z * rsqrt(max(||z||^2, 1e-24))
    sumsq = jnp.sum(z * z, axis=1, keepdims=True)                # [tb, 1]
    zn = z * jax.lax.rsqrt(jnp.maximum(sumsq, 1e-24))
    zn = zn + noise_ref[...] * noise_scale                       # torch.randn_like(z)*std

    # ---- decoder: h2 = relu(zn @ W3t + b3) ; out = h2 @ W4t + b4 ----
    # Noise on the padded latent column is ignored: the matching W3t row is zero.
    h2 = jnp.dot(zn, w3_ref[...], preferred_element_type=jnp.float32) + b3_ref[...]
    h2 = jnp.maximum(h2, 0.0)
    out_ref[...] = (jnp.dot(h2, w4_ref[...], preferred_element_type=jnp.float32)
                    + b4_ref[...])


def autoencoder_forward(x, params, key, noise_scale, tile_batch=8192):
    """x: [batch, in_dim] f32 -> [batch, in_dim] f32 (forward pass with AWGN)."""
    w1, b1, w2, b2, w3, b3, w4, b4 = params     # weights pre-transposed [in, out]
    batch, in_dim = x.shape
    n_pad = w2.shape[1]

    # Pad the batch only to the 128 granule (never to a multiple of tb).
    padded = _round_up(batch, 128)
    # Large tiles to amortize per-grid-step overhead, but keep >= 2 steps when the
    # batch allows it so the "parallel" axis can span both v7x TensorCores.
    tb = min(_round_up(tile_batch, 128),
             max(128, _round_up(pl.cdiv(padded, 2), 128)))
    grid = pl.cdiv(padded, tb)                   # ragged last tile handled by Pallas

    if padded != batch:
        x = jnp.pad(x, ((0, padded - batch), (0, 0)))

    # torch.randn_like-equivalent noise stream; generated outside the kernel so the
    # kernel has no TPU-only PRNG dependency (also runs under interpret mode).
    noise = jax.random.normal(key, (padded, n_pad), jnp.float32)

    kernel = functools.partial(autoencoder_kernel, noise_scale=float(noise_scale))

    def resident(a):
        # Full-array block, constant index_map -> stays resident in VMEM across steps.
        return pl.BlockSpec(a.shape, lambda i: (0, 0))

    out = pl.pallas_call(
        kernel,
        out_shape=jax.ShapeDtypeStruct((padded, in_dim), jnp.float32),
        grid=(grid,),
        in_specs=[
            pl.BlockSpec((tb, in_dim), lambda i: (i, 0)),   # x tile
            pl.BlockSpec((tb, n_pad), lambda i: (i, 0)),    # noise tile
            resident(w1), resident(b1),
            resident(w2), resident(b2),
            resident(w3), resident(b3),
            resident(w4), resident(b4),
        ],
        out_specs=pl.BlockSpec((tb, in_dim), lambda i: (i, 0)),
        compiler_params=pltpu.CompilerParams(
            dimension_semantics=("parallel",),   # megacore sharding on v7x
        ),
    )(x, noise, w1, b1, w2, b2, w3, b3, w4, b4)

    return out[:batch]


def init_linear(key, fan_in, fan_out):
    """PyTorch nn.Linear default init: U(-1/sqrt(fan_in), 1/sqrt(fan_in)).
    Returns (Wt [fan_in, fan_out], b [1, fan_out]) — weight pre-transposed."""
    kw, kb = jax.random.split(key)
    bound = 1.0 / math.sqrt(fan_in)
    w = jax.random.uniform(kw, (fan_out, fan_in), jnp.float32, -bound, bound)
    b = jax.random.uniform(kb, (1, fan_out), jnp.float32, -bound, bound)
    return w.T, b


if __name__ == "__main__":
    # args: k=4, n=7, snr_db=7  (classic (7,4) autoencoder-channel setup)
    k_bits = 4
    n_channel = 7
    snr_db = 7.0

    in_dim = 2 ** k_bits            # 16
    comp_dim = n_channel            # 7
    batch = 8

    rate = k_bits / n_channel
    SNR = round(10 ** (snr_db / 10), 4)
    variance = 1.0 / (2.0 * rate * SNR)
    noise_scale = float(variance ** 0.5)

    key = jax.random.PRNGKey(0)
    kx, knoise, k1, k2, k3, k4 = jax.random.split(key, 6)

    # Deterministic parameters (weights pre-transposed to [in, out]).
    w1, b1 = init_linear(k1, in_dim, in_dim)       # encoder.0
    w2, b2 = init_linear(k2, in_dim, comp_dim)     # encoder.2
    w3, b3 = init_linear(k3, comp_dim, in_dim)     # decoder.0
    w4, b4 = init_linear(k4, in_dim, in_dim)       # decoder.2

    # Pad the latent dim 7 -> 8 with zero weight cols/rows (mathematically identical;
    # keeps z / noise / zn on full 8-sublane f32 groups).
    n_pad = _round_up(comp_dim, 8)
    w2 = jnp.pad(w2, ((0, 0), (0, n_pad - comp_dim)))
    b2 = jnp.pad(b2, ((0, 0), (0, n_pad - comp_dim)))
    w3 = jnp.pad(w3, ((0, n_pad - comp_dim), (0, 0)))
    params = (w1, b1, w2, b2, w3, b3, w4, b4)

    x = jax.random.normal(kx, (batch, in_dim), jnp.float32)

    out = autoencoder_forward(x, params, key=knoise, noise_scale=noise_scale)
    out = jax.block_until_ready(out)
    assert out.shape == (batch, in_dim) and out.dtype == jnp.float32
    assert bool(jnp.all(jnp.isfinite(out)))

    print("KERNEL_OK")
</pallas_src>

<mosaic_0001>
module attributes {stable_mosaic.version = 11 : i64} {
  func.func @autoencoder_kernel(%arg0: i32, %arg1: memref<128x16xf32, #tpu.memory_space<vmem>>, %arg2: memref<128x8xf32, #tpu.memory_space<vmem>>, %arg3: memref<16x16xf32, #tpu.memory_space<vmem>>, %arg4: memref<1x16xf32, #tpu.memory_space<vmem>>, %arg5: memref<16x8xf32, #tpu.memory_space<vmem>>, %arg6: memref<1x8xf32, #tpu.memory_space<vmem>>, %arg7: memref<8x16xf32, #tpu.memory_space<vmem>>, %arg8: memref<1x16xf32, #tpu.memory_space<vmem>>, %arg9: memref<16x16xf32, #tpu.memory_space<vmem>>, %arg10: memref<1x16xf32, #tpu.memory_space<vmem>>, %arg11: memref<128x16xf32, #tpu.memory_space<vmem>>) attributes {dimension_semantics = [#tpu.dimension_semantics<parallel>], iteration_bounds = array<i64: 1>, scalar_prefetch = 0 : i64, scratch_operands = 0 : i64, tpu.core_type = #tpu.core_type<tc>, window_params = [{transform_indices = @transform_0, window_bounds = array<i64: 128, 16>}, {transform_indices = @transform_1, window_bounds = array<i64: 128, 8>}, {pipeline_mode = #tpu.pipeline_mode<synchronous>, transform_indices = @transform_2, window_bounds = array<i64: 16, 16>}, {pipeline_mode = #tpu.pipeline_mode<synchronous>, transform_indices = @transform_3, window_bounds = array<i64: 1, 16>}, {pipeline_mode = #tpu.pipeline_mode<synchronous>, transform_indices = @transform_4, window_bounds = array<i64: 16, 8>}, {pipeline_mode = #tpu.pipeline_mode<synchronous>, transform_indices = @transform_5, window_bounds = array<i64: 1, 8>}, {pipeline_mode = #tpu.pipeline_mode<synchronous>, transform_indices = @transform_6, window_bounds = array<i64: 8, 16>}, {pipeline_mode = #tpu.pipeline_mode<synchronous>, transform_indices = @transform_7, window_bounds = array<i64: 1, 16>}, {pipeline_mode = #tpu.pipeline_mode<synchronous>, transform_indices = @transform_8, window_bounds = array<i64: 16, 16>}, {pipeline_mode = #tpu.pipeline_mode<synchronous>, transform_indices = @transform_9, window_bounds = array<i64: 1, 16>}, {transform_indices = @transform_10, window_bounds = array<i64: 128, 16>}]} {
    %c0 = arith.constant 0 : index
    %c0_0 = arith.constant 0 : index
    %0 = vector.load %arg1[%c0, %c0_0] : memref<128x16xf32, #tpu.memory_space<vmem>>, vector<128x16xf32>
    %c0_1 = arith.constant 0 : index
    %c0_2 = arith.constant 0 : index
    %1 = vector.load %arg3[%c0_1, %c0_2] : memref<16x16xf32, #tpu.memory_space<vmem>>, vector<16x16xf32>
    %cst = arith.constant dense<0.000000e+00> : vector<128x16xf32>
    %2 = tpu.matmul %0, %1, %cst {dimension_numbers = #tpu.dot_dimension_numbers<[1], [0], [0], [1], [0, 0, 1, 1], [], []>} : vector<128x16xf32>, vector<16x16xf32>, vector<128x16xf32> -> vector<128x16xf32>
    %c0_3 = arith.constant 0 : index
    %c0_4 = arith.constant 0 : index
    %3 = vector.load %arg4[%c0_3, %c0_4] : memref<1x16xf32, #tpu.memory_space<vmem>>, vector<1x16xf32>
    %4 = vector.broadcast %3 : vector<1x16xf32> to vector<128x16xf32>
    %5 = arith.addf %2, %4 : vector<128x16xf32>
    %cst_5 = arith.constant 0.000000e+00 : f32
    %6 = vector.broadcast %cst_5 : f32 to vector<128x16xf32>
    %7 = arith.maximumf %5, %6 : vector<128x16xf32>
    %c0_6 = arith.constant 0 : index
    %c0_7 = arith.constant 0 : index
    %8 = vector.load %arg5[%c0_6, %c0_7] : memref<16x8xf32, #tpu.memory_space<vmem>>, vector<16x8xf32>
    %cst_8 = arith.constant dense<0.000000e+00> : vector<128x8xf32>
    %9 = tpu.matmul %7, %8, %cst_8 {dimension_numbers = #tpu.dot_dimension_numbers<[1], [0], [0], [1], [0, 0, 1, 1], [], []>} : vector<128x16xf32>, vector<16x8xf32>, vector<128x8xf32> -> vector<128x8xf32>
    %c0_9 = arith.constant 0 : index
    %c0_10 = arith.constant 0 : index
    %10 = vector.load %arg6[%c0_9, %c0_10] : memref<1x8xf32, #tpu.memory_space<vmem>>, vector<1x8xf32>
    %11 = vector.broadcast %10 : vector<1x8xf32> to vector<128x8xf32>
    %12 = arith.addf %9, %11 : vector<128x8xf32>
    %13 = arith.mulf %12, %12 : vector<128x8xf32>
    %cst_11 = arith.constant dense<0.000000e+00> : vector<128xf32>
    %14 = vector.multi_reduction <add>, %13, %cst_11 [1] : vector<128x8xf32> to vector<128xf32>
    %15 = vector.shape_cast %14 : vector<128xf32> to vector<128x1xf32>
    %cst_12 = arith.constant 1.000000e-24 : f32
    %16 = vector.broadcast %cst_12 : f32 to vector<128x1xf32>
    %17 = arith.maximumf %15, %16 : vector<128x1xf32>
    %18 = math.rsqrt %17 : vector<128x1xf32>
    %19 = vector.broadcast %18 : vector<128x1xf32> to vector<128x8xf32>
    %20 = arith.mulf %12, %19 : vector<128x8xf32>
    %c0_13 = arith.constant 0 : index
    %c0_14 = arith.constant 0 : index
    %21 = vector.load %arg2[%c0_13, %c0_14] : memref<128x8xf32, #tpu.memory_space<vmem>>, vector<128x8xf32>
    %cst_15 = arith.constant 0.41783309 : f32
    %22 = vector.broadcast %cst_15 : f32 to vector<128x8xf32>
    %23 = arith.mulf %21, %22 : vector<128x8xf32>
    %24 = arith.addf %20, %23 : vector<128x8xf32>
    %c0_16 = arith.constant 0 : index
    %c0_17 = arith.constant 0 : index
    %25 = vector.load %arg7[%c0_16, %c0_17] : memref<8x16xf32, #tpu.memory_space<vmem>>, vector<8x16xf32>
    %cst_18 = arith.constant dense<0.000000e+00> : vector<128x16xf32>
    %26 = tpu.matmul %24, %25, %cst_18 {dimension_numbers = #tpu.dot_dimension_numbers<[1], [0], [0], [1], [0, 0, 1, 1], [], []>} : vector<128x8xf32>, vector<8x16xf32>, vector<128x16xf32> -> vector<128x16xf32>
    %c0_19 = arith.constant 0 : index
    %c0_20 = arith.constant 0 : index
    %27 = vector.load %arg8[%c0_19, %c0_20] : memref<1x16xf32, #tpu.memory_space<vmem>>, vector<1x16xf32>
    %28 = vector.broadcast %27 : vector<1x16xf32> to vector<128x16xf32>
    %29 = arith.addf %26, %28 : vector<128x16xf32>
    %cst_21 = arith.constant 0.000000e+00 : f32
    %30 = vector.broadcast %cst_21 : f32 to vector<128x16xf32>
    %31 = arith.maximumf %29, %30 : vector<128x16xf32>
    %c0_22 = arith.constant 0 : index
    %c0_23 = arith.constant 0 : index
    %32 = vector.load %arg9[%c0_22, %c0_23] : memref<16x16xf32, #tpu.memory_space<vmem>>, vector<16x16xf32>
    %cst_24 = arith.constant dense<0.000000e+00> : vector<128x16xf32>
    %33 = tpu.matmul %31, %32, %cst_24 {dimension_numbers = #tpu.dot_dimension_numbers<[1], [0], [0], [1], [0, 0, 1, 1], [], []>} : vector<128x16xf32>, vector<16x16xf32>, vector<128x16xf32> -> vector<128x16xf32>
    %c0_25 = arith.constant 0 : index
    %c0_26 = arith.constant 0 : index
    %34 = vector.load %arg10[%c0_25, %c0_26] : memref<1x16xf32, #tpu.memory_space<vmem>>, vector<1x16xf32>
    %35 = vector.broadcast %34 : vector<1x16xf32> to vector<128x16xf32>
    %36 = arith.addf %33, %35 : vector<128x16xf32>
    %c0_27 = arith.constant 0 : index
    %c0_28 = arith.constant 0 : index
    %37 = vector.load %arg11[%c0_27, %c0_28] : memref<128x16xf32, #tpu.memory_space<vmem>>, vector<128x16xf32>
    tpu.vector_store %arg11[%c0_27, %c0_28], %36 {strides = array<i32>} : memref<128x16xf32, #tpu.memory_space<vmem>>, vector<128x16xf32>,
    return
  }
  func.func @transform_0(%arg0: i32) -> (i32, i32) {
    %c0_i32 = arith.constant 0 : i32
    %c0_i32_0 = arith.constant 0 : i32
    return %arg0, %c0_i32 : i32, i32
  }
  func.func @transform_1(%arg0: i32) -> (i32, i32) {
    %c0_i32 = arith.constant 0 : i32
    %c0_i32_0 = arith.constant 0 : i32
    return %arg0, %c0_i32 : i32, i32
  }
  func.func @transform_2(%arg0: i32) -> (i32, i32) {
    %c0_i32 = arith.constant 0 : i32
    %c0_i32_0 = arith.constant 0 : i32
    %c0_i32_1 = arith.constant 0 : i32
    return %c0_i32, %c0_i32_0 : i32, i32
  }
  func.func @transform_3(%arg0: i32) -> (i32, i32) {
    %c0_i32 = arith.constant 0 : i32
    %c0_i32_0 = arith.constant 0 : i32
    %c0_i32_1 = arith.constant 0 : i32
    return %c0_i32, %c0_i32_0 : i32, i32
  }
  func.func @transform_4(%arg0: i32) -> (i32, i32) {
    %c0_i32 = arith.constant 0 : i32
    %c0_i32_0 = arith.constant 0 : i32
    %c0_i32_1 = arith.constant 0 : i32
    return %c0_i32, %c0_i32_0 : i32, i32
  }
  func.func @transform_5(%arg0: i32) -> (i32, i32) {
    %c0_i32 = arith.constant 0 : i32
    %c0_i32_0 = arith.constant 0 : i32
    %c0_i32_1 = arith.constant 0 : i32
    return %c0_i32, %c0_i32_0 : i32, i32
  }
  func.func @transform_6(%arg0: i32) -> (i32, i32) {
    %c0_i32 = arith.constant 0 : i32
    %c0_i32_0 = arith.constant 0 : i32
    %c0_i32_1 = arith.constant 0 : i32
    return %c0_i32, %c0_i32_0 : i32, i32
  }
  func.func @transform_7(%arg0: i32) -> (i32, i32) {
    %c0_i32 = arith.constant 0 : i32
    %c0_i32_0 = arith.constant 0 : i32
    %c0_i32_1 = arith.constant 0 : i32
    return %c0_i32, %c0_i32_0 : i32, i32
  }
  func.func @transform_8(%arg0: i32) -> (i32, i32) {
    %c0_i32 = arith.constant 0 : i32
    %c0_i32_0 = arith.constant 0 : i32
    %c0_i32_1 = arith.constant 0 : i32
    return %c0_i32, %c0_i32_0 : i32, i32
  }
  func.func @transform_9(%arg0: i32) -> (i32, i32) {
    %c0_i32 = arith.constant 0 : i32
    %c0_i32_0 = arith.constant 0 : i32
    %c0_i32_1 = arith.constant 0 : i32
    return %c0_i32, %c0_i32_0 : i32, i32
  }
  func.func @transform_10(%arg0: i32) -> (i32, i32) {
    %c0_i32 = arith.constant 0 : i32
    %c0_i32_0 = arith.constant 0 : i32
    return %arg0, %c0_i32 : i32, i32
  }
}

</mosaic_0001>

<bundles_post_ra>
// kernel: tpu_custom_call.1
= control target key start
LH: loop header
LB: loop body
LE: loop exit
PB: predicated region body
PF: predicated region fallthrough
CT: control target
= control target key end

     0   :  { %vm60_vm0 = vcmask 130048   ;;  %vm488_vm1 = vcmask 64512   ;;  %s1791_s2 = inlined_call_operand.vmem [shape: f32[16,16], index: 2, kind: input, shape index: {}]   ;;  %s1792_s0 = inlined_call_operand.vmem [shape: f32[128,16], index: 0, kind: input, shape index: {}]   ;;  %s1793_s4 = inlined_call_operand.vmem [shape: f32[16,8], index: 4, kind: input, shape index: {}]   ;;  %s1794_s3 = inlined_call_operand.vmem [shape: f32[1,16], index: 3, kind: input, shape index: {}]   ;;  %s1795_s6 = inlined_call_operand.vmem [shape: f32[8,16], index: 6, kind: input, shape index: {}]   ;;  %s1796_s5 = inlined_call_operand.vmem [shape: f32[1,8], index: 5, kind: input, shape index: {}]   ;;  %s1797_s8 = inlined_call_operand.vmem [shape: f32[16,16], index: 8, kind: input, shape index: {}]   ;;  %s1798_s1 = inlined_call_operand.vmem [shape: f32[128,8], index: 1, kind: input, shape index: {}]   ;;  %s1799_s7 = inlined_call_operand.vmem [shape: f32[1,16], index: 7, kind: input, shape index: {}]   ;;  %s1800_s9 = inlined_call_operand.vmem [shape: f32[1,16], index: 9, kind: input, shape index: {}]   ;;  %s1801_s10 = inlined_call_operand.vmem [shape: f32[128,16], index: 10, kind: output, shape index: {}]  }
   0x1   :  { %v51_v0 = vld [vmem:[%s1791_s2] sm:$0xff]  ;;  %v52_v1 = vld [vmem:[%s1791_s2 + $0x8] sm:$0xff]  ;;  %v37_v5 = vld [vmem:[%s1792_s0 + $0x10] sm:$0xff] }
   0x2   :  { %v35_v2 = vld [vmem:[%s1792_s0] sm:$0xff]  ;;  %v1321_v3 = vpack.c.bf16 %v52_v1, %v51_v0  ;;  %v36_v4 = vld [vmem:[%s1792_s0 + $0x8] sm:$0xff]  ;;  %v38_v6 = vld [vmem:[%s1792_s0 + $0x18] sm:$0xff] }
   0x3   :  { %1215 = vmatprep.mubr.msk.f32.mxu0 %vm60_vm0, %v35_v2  ;;  %v39_v7 = vld [vmem:[%s1792_s0 + $0x20] sm:$0xff]  ;;  %v40_v8 = vld [vmem:[%s1792_s0 + $0x28] sm:$0xff]  ;;  %v41_v9 = vld [vmem:[%s1792_s0 + $0x30] sm:$0xff] }
   0x4   :  { %1322 = vmatprep.subr.bf16.mxu0 %v1321_v3  ;;  %v42_v10 = vld [vmem:[%s1792_s0 + $0x38] sm:$0xff]  ;;  %v43_v11 = vld [vmem:[%s1792_s0 + $0x40] sm:$0xff]  ;;  %v44_v12 = vld [vmem:[%s1792_s0 + $0x48] sm:$0xff] }
   0x5   :  { %1324 = vmatpush3.bf16.msra.mxu0 %v1321_v3  ;;  %v45_v13 = vld [vmem:[%s1792_s0 + $0x50] sm:$0xff]  ;;  %v46_v14 = vld [vmem:[%s1792_s0 + $0x58] sm:$0xff]  ;;  %v47_v15 = vld [vmem:[%s1792_s0 + $0x60] sm:$0xff] }
   0x6   :  { %v48_v16 = vld [vmem:[%s1792_s0 + $0x68] sm:$0xff]  ;;  %v49_v17 = vld [vmem:[%s1792_s0 + $0x70] sm:$0xff]  ;;  %v50_v18 = vld [vmem:[%s1792_s0 + $0x78] sm:$0xff] }
   0x7   :  { %v270_v19 = vld [vmem:[%s1793_s4] sm:$0xff]  ;;  %v271_v20 = vld [vmem:[%s1793_s4 + $0x8] sm:$0xff] }
   0x8   :  { %1216 = vmatmul.mubr.msk.f32.vlgmr.msra.gmra.mrb[0].mxu0 %vm60_vm0, %v36_v4  ;;  %v1325_v21 = vpack.c.bf16 %v271_v20, %v270_v19  ;;  %v1072_v22 = vld [vmem:[%s1794_s3] ss:$0 sm:$0xff] }
   0x9   :  { %1218 = vmatprep.mubr.msk.f32.mxu0 %vm60_vm0, %v37_v5 }
   0xa   :  { %1326 = vmatprep.subr.bf16.mxu1 %v1325_v21 }
   0xb   :  { %1328 = vmatpush3.bf16.msra.mxu1 %v1325_v21 }
   0xc   :  { %1219 = vmatmul.mubr.msk.f32.gmra.mrb[2].mxu0 %vm60_vm0, %v38_v6 }
   0xd   :  { %1221 = vmatprep.mubr.msk.f32.mxu0 %vm60_vm0, %v39_v7  ;;  %v633_v7 = vld [vmem:[%s1795_s6] sm:$0xff] }
   0xe   :  { %1267 = vmatprep.subr.mxu0 %v633_v7 }
   0xf   :  { %1268 = vmatpush3.msra.mxu0 %v633_v7 }
  0x10   :  { %1222 = vmatmul.mubr.msk.f32.gmra.mrb[4].mxu0 %vm60_vm0, %v40_v8  ;;  %v1521_v8 = vld [vmem:[%s1796_s5] ss:$0 sm:$0xff] }
  0x11   :  { %1224 = vmatprep.mubr.msk.f32.mxu0 %vm60_vm0, %v41_v9 }
  0x14   :  { %1225 = vmatmul.mubr.msk.f32.gmra.mrb[6].mxu0 %vm60_vm0, %v42_v10 }
  0x15   :  { %1227 = vmatprep.mubr.msk.f32.mxu0 %vm60_vm0, %v43_v11 }
  0x18   :  { %1228 = vmatmul.mubr.msk.f32.gmra.mrb[8].mxu0 %vm60_vm0, %v44_v12 }
  0x19   :  { %1230 = vmatprep.mubr.msk.f32.mxu0 %vm60_vm0, %v45_v13 }
  0x1c   :  { %1231 = vmatmul.mubr.msk.f32.gmra.mrb[10].mxu0 %vm60_vm0, %v46_v14 }
  0x1d   :  { %1233 = vmatprep.mubr.msk.f32.mxu0 %vm60_vm0, %v47_v15 }
  0x20   :  { %1234 = vmatmul.mubr.msk.f32.gmra.mrb[12].mxu0 %vm60_vm0, %v48_v16 }
  0x21   :  { %1236 = vmatprep.mubr.msk.f32.mxu0 %vm60_vm0, %v49_v17 }
  0x24   :  { %1237 = vmatmul.mubr.msk.f32.gmra.mrb[14].mxu0 %vm60_vm0, %v50_v18 }
  0xdb   :  { %v1217_v23 = vpop.f32.mrb[0].mxu0 }
  0xdc   :  { %v181_v24 = vadd.f32 %v1217_v23, %v1072_v22  ;;  %v175_v25 = vpop.f32.mrb[1].mxu0 }
  0xdd   :  { %v176_v26 = vadd.f32 %v1072_v22, %v175_v25 }
  0xde   :  { %v255_v29 = vmax.f32 %v181_v24, 0.0 }
  0xdf   :  { %v254_v27 = vmax.f32 %v176_v26, 0.0  ;;  %v1220_v28 = vpop.f32.mrb[2].mxu0 }
  0xe0   :  { %v191_v30 = vadd.f32 %v1220_v28, %v1072_v22  ;;  %v185_v31 = vpop.f32.mrb[3].mxu0 }
  0xe1   :  { %v186_v32 = vadd.f32 %v1072_v22, %v185_v31  ;;  %1243 = vmatprep.mubr.msk.f32.mxu1 %vm60_vm0, %v254_v27 }
  0xe2   :  { %1244 = vmatmul.mubr.msk.f32.vlgmr.msra.gmra.mrb[0].mxu1 %vm60_vm0, %v255_v29  ;;  %v257_v35 = vmax.f32 %v191_v30, 0.0 }
  0xe3   :  { %v256_v33 = vmax.f32 %v186_v32, 0.0  ;;  %v1223_v34 = vpop.f32.mrb[4].mxu0 }
  0xe4   :  { %v201_v36 = vadd.f32 %v1223_v34, %v1072_v22  ;;  %v195_v37 = vpop.f32.mrb[5].mxu0 }
  0xe5   :  { %v196_v38 = vadd.f32 %v1072_v22, %v195_v37  ;;  %1246 = vmatprep.mubr.msk.f32.mxu1 %vm60_vm0, %v256_v33 }
  0xe6   :  { %v259_v39 = vmax.f32 %v201_v36, 0.0  ;;  %1247 = vmatmul.mubr.msk.f32.gmra.mrb[2].mxu1 %vm60_vm0, %v257_v35 }
  0xe7   :  { %v258_v40 = vmax.f32 %v196_v38, 0.0  ;;  %v1226_v41 = vpop.f32.mrb[6].mxu0 }
  0xe8   :  { %v211_v42 = vadd.f32 %v1226_v41, %v1072_v22  ;;  %v205_v43 = vpop.f32.mrb[7].mxu0 }
  0xe9   :  { %v206_v44 = vadd.f32 %v1072_v22, %v205_v43  ;;  %1249 = vmatprep.mubr.msk.f32.mxu1 %vm60_vm0, %v258_v40 }
  0xea   :  { %v261_v45 = vmax.f32 %v211_v42, 0.0  ;;  %1250 = vmatmul.mubr.msk.f32.gmra.mrb[4].mxu1 %vm60_vm0, %v259_v39 }
  0xeb   :  { %v260_v46 = vmax.f32 %v206_v44, 0.0  ;;  %v1229_v47 = vpop.f32.mrb[8].mxu0 }
  0xec   :  { %v221_v48 = vadd.f32 %v1229_v47, %v1072_v22  ;;  %v215_v49 = vpop.f32.mrb[9].mxu0 }
  0xed   :  { %v216_v50 = vadd.f32 %v1072_v22, %v215_v49  ;;  %1252 = vmatprep.mubr.msk.f32.mxu1 %vm60_vm0, %v260_v46 }
  0xee   :  { %v263_v51 = vmax.f32 %v221_v48, 0.0  ;;  %1253 = vmatmul.mubr.msk.f32.gmra.mrb[6].mxu1 %vm60_vm0, %v261_v45 }
  0xef   :  { %v262_v52 = vmax.f32 %v216_v50, 0.0  ;;  %v1232_v53 = vpop.f32.mrb[10].mxu0 }
  0xf0   :  { %v231_v54 = vadd.f32 %v1232_v53, %v1072_v22  ;;  %v225_v55 = vpop.f32.mrb[11].mxu0 }
  0xf1   :  { %v226_v56 = vadd.f32 %v1072_v22, %v225_v55  ;;  %1255 = vmatprep.mubr.msk.f32.mxu1 %vm60_vm0, %v262_v52 }
  0xf2   :  { %v265_v57 = vmax.f32 %v231_v54, 0.0  ;;  %1256 = vmatmul.mubr.msk.f32.gmra.mrb[8].mxu1 %vm60_vm0, %v263_v51 }
  0xf3   :  { %v264_v58 = vmax.f32 %v226_v56, 0.0  ;;  %v1235_v59 = vpop.f32.mrb[12].mxu0 }
  0xf4   :  { %v241_v60 = vadd.f32 %v1235_v59, %v1072_v22  ;;  %v235_v61 = vpop.f32.mrb[13].mxu0 }
  0xf5   :  { %v236_v62 = vadd.f32 %v1072_v22, %v235_v61  ;;  %1258 = vmatprep.mubr.msk.f32.mxu1 %vm60_vm0, %v264_v58 }
  0xf6   :  { %v267_v63 = vmax.f32 %v241_v60, 0.0  ;;  %1259 = vmatmul.mubr.msk.f32.gmra.mrb[10].mxu1 %vm60_vm0, %v265_v57 }
  0xf7   :  { %v266_v0 = vmax.f32 %v236_v62, 0.0  ;;  %v1238_v1 = vpop.f32.mrb[14].mxu0 }
  0xf8   :  { %v251_v2 = vadd.f32 %v1238_v1, %v1072_v22  ;;  %v245_v3 = vpop.f32.mrb[15].mxu0 }
  0xf9   :  { %v246_v4 = vadd.f32 %v1072_v22, %v245_v3  ;;  %1261 = vmatprep.mubr.msk.f32.mxu1 %vm60_vm0, %v266_v0 }
  0xfa   :  { %v269_v5 = vmax.f32 %v251_v2, 0.0  ;;  %1262 = vmatmul.mubr.msk.f32.gmra.mrb[12].mxu1 %vm60_vm0, %v267_v63 }
  0xfb   :  { %v268_v6 = vmax.f32 %v246_v4, 0.0 }
  0xfd   :  { %1264 = vmatprep.mubr.msk.f32.mxu1 %vm60_vm0, %v268_v6 }
  0xfe   :  { %1265 = vmatmul.mubr.msk.f32.gmra.mrb[14].mxu1 %vm60_vm0, %v269_v5 }
 0x1b5   :  { %v1245_v9 = vpop.f32.mrb[0].mxu1 }
 0x1b6   :  { %v393_v10 = vpop.f32.mrb[1].mxu1  ;;  %v1524_v11 = vadd.f32 %v1245_v9, %v1521_v8  ;;  %v850_v9 = vld [vmem:[%s1797_s8] sm:$0xff] }
 0x1b7   :  { %v1527_v12 = vadd.f32 %v1521_v8, %v393_v10  ;;  %v851_v10 = vld [vmem:[%s1797_s8 + $0x8] sm:$0xff] }
 0x1b8   :  { %v473_v19 = vmul.f32 %v1524_v11, %v1524_v11 }
 0x1b9   :  { %v1248_v13 = vpop.f32.mrb[2].mxu1  ;;  %v472_v14 = vmul.f32 %v1527_v12, %v1527_v12 }
 0x1ba   :  { %v403_v15 = vpop.f32.mrb[3].mxu1  ;;  %v1532_v16 = vadd.f32 %v1248_v13, %v1521_v8  ;;  %v492_v26 = vsel %vm488_vm1, %v473_v19, 0.0  ;;  %v1329_v13 = vpack.c.bf16 %v851_v10, %v850_v9 }
 0x1bb   :  { %v1535_v17 = vadd.f32 %v1521_v8, %v403_v15  ;;  %v489_v18 = vsel %vm488_vm1, %v472_v14, 0.0 }
 0x1bc   :  { %490 = vadd.xlane.f32.xlu0 %v489_v18  ;;  %v475_v27 = vmul.f32 %v1532_v16, %v1532_v16  ;;  %1330 = vmatprep.subr.bf16.mxu1 %v1329_v13 }
 0x1bd   :  { %v1251_v20 = vpop.f32.mrb[4].mxu1  ;;  %v474_v21 = vmul.f32 %v1535_v17, %v1535_v17  ;;  %1332 = vmatpush3.bf16.msra.mxu1 %v1329_v13 }
 0x1be   :  { %v1543_v22 = vadd.f32 %v1251_v20, %v1521_v8  ;;  %v413_v23 = vpop.f32.mrb[5].mxu1  ;;  %v498_v34 = vsel %vm488_vm1, %v475_v27, 0.0 }
 0x1bf   :  { %v1546_v24 = vadd.f32 %v1521_v8, %v413_v23  ;;  %v495_v25 = vsel %vm488_vm1, %v474_v21, 0.0 }
 0x1c0   :  { %496 = vadd.xlane.f32.xlu1 %v495_v25  ;;  %493 = vadd.xlane.f32.xlu0 %v492_v26  ;;  %v477_v31 = vmul.f32 %v1543_v22, %v1543_v22 }
 0x1c1   :  { %v1254_v28 = vpop.f32.mrb[6].mxu1  ;;  %v476_v29 = vmul.f32 %v1546_v24, %v1546_v24 }
 0x1c2   :  { %v423_v30 = vpop.f32.mrb[7].mxu1  ;;  %v1557_v32 = vadd.f32 %v1254_v28, %v1521_v8  ;;  %v504_v39 = vsel %vm488_vm1, %v477_v31, 0.0  ;;  %v585_v28 = vld [vmem:[%s1798_s1] sm:$0xff] }
 0x1c3   :  { %v1560_v33 = vadd.f32 %v1521_v8, %v423_v30  ;;  %v501_v35 = vsel %vm488_vm1, %v476_v29, 0.0  ;;  %v601_v31 = vmul.f32 0.4178331, %v585_v28 }
 0x1c4   :  { %499 = vadd.xlane.f32.xlu1 %v498_v34  ;;  %502 = vadd.xlane.f32.xlu0 %v501_v35  ;;  %v479_v43 = vmul.f32 %v1557_v32, %v1557_v32  ;;  %v586_v35 = vld [vmem:[%s1798_s1 + $0x8] sm:$0xff] }
 0x1c5   :  { %v1257_v36 = vpop.f32.mrb[8].mxu1  ;;  %v478_v37 = vmul.f32 %v1560_v33, %v1560_v33 }
 0x1c6   :  { %v433_v38 = vpop.f32.mrb[9].mxu1  ;;  %v1568_v40 = vadd.f32 %v1257_v36, %v1521_v8  ;;  %v510_v49 = vsel %vm488_vm1, %v479_v43, 0.0 }
 0x1c7   :  { %v1571_v41 = vadd.f32 %v1521_v8, %v433_v38  ;;  %v507_v42 = vsel %vm488_vm1, %v478_v37, 0.0  ;;  %v587_v38 = vld [vmem:[%s1798_s1 + $0x10] sm:$0xff] }
 0x1c8   :  { %505 = vadd.xlane.f32.xlu1 %v504_v39  ;;  %508 = vadd.xlane.f32.xlu0 %v507_v42  ;;  %v481_v51 = vmul.f32 %v1568_v40, %v1568_v40  ;;  %v602_v42 = vmul.f32 0.4178331, %v586_v35 }
 0x1c9   :  { %v1260_v44 = vpop.f32.mrb[10].mxu1  ;;  %v480_v45 = vmul.f32 %v1571_v41, %v1571_v41 }
 0x1ca   :  { %v1579_v46 = vadd.f32 %v1260_v44, %v1521_v8  ;;  %v443_v47 = vpop.f32.mrb[11].mxu1  ;;  %v516_v58 = vsel %vm488_vm1, %v481_v51, 0.0 }
 0x1cb   :  { %v1582_v48 = vadd.f32 %v1521_v8, %v443_v47  ;;  %v513_v50 = vsel %vm488_vm1, %v480_v45, 0.0  ;;  %v603_v47 = vmul.f32 0.4178331, %v587_v38 }
 0x1cc   :  { %511 = vadd.xlane.f32.xlu1 %v510_v49  ;;  %514 = vadd.xlane.f32.xlu0 %v513_v50  ;;  %v483_v55 = vmul.f32 %v1579_v46, %v1579_v46 }
 0x1cd   :  { %v1263_v52 = vpop.f32.mrb[12].mxu1  ;;  %v482_v53 = vmul.f32 %v1582_v48, %v1582_v48 }
 0x1ce   :  { %v453_v54 = vpop.f32.mrb[13].mxu1  ;;  %v1593_v56 = vadd.f32 %v1263_v52, %v1521_v8  ;;  %v522_v63 = vsel %vm488_vm1, %v483_v55, 0.0  ;;  %v588_v52 = vld [vmem:[%s1798_s1 + $0x18] sm:$0xff] }
 0x1cf   :  { %v1596_v57 = vadd.f32 %v1521_v8, %v453_v54  ;;  %v519_v59 = vsel %vm488_vm1, %v482_v53, 0.0  ;;  %v589_v53 = vld [vmem:[%s1798_s1 + $0x20] sm:$0xff] }
 0x1d0   :  { %517 = vadd.xlane.f32.xlu1 %v516_v58  ;;  %520 = vadd.xlane.f32.xlu0 %v519_v59  ;;  %v485_v3 = vmul.f32 %v1593_v56, %v1593_v56 }
 0x1d1   :  { %v1266_v60 = vpop.f32.mrb[14].mxu1  ;;  %v484_v61 = vmul.f32 %v1596_v57, %v1596_v57 }
 0x1d2   :  { %v463_v62 = vpop.f32.mrb[15].mxu1  ;;  %v1604_v0 = vadd.f32 %v1266_v60, %v1521_v8  ;;  %v528_v5 = vsel %vm488_vm1, %v485_v3, 0.0 }
 0x1d3   :  { %v1607_v1 = vadd.f32 %v1521_v8, %v463_v62  ;;  %v525_v2 = vsel %vm488_vm1, %v484_v61, 0.0  ;;  %v604_v61 = vmul.f32 0.4178331, %v588_v52  ;;  %v605_v62 = vmul.f32 0.4178331, %v589_v53 }
 0x1d4   :  { %523 = vadd.xlane.f32.xlu1 %v522_v63  ;;  %526 = vadd.xlane.f32.xlu0 %v525_v2  ;;  %v487_v7 = vmul.f32 %v1604_v0, %v1604_v0 }
 0x1d5   :  { %v486_v4 = vmul.f32 %v1607_v1, %v1607_v1 }
 0x1d6   :  { %v534_v8 = vsel %vm488_vm1, %v487_v7, 0.0 }
 0x1d7   :  { %v531_v6 = vsel %vm488_vm1, %v486_v4, 0.0 }
 0x1d8   :  { %529 = vadd.xlane.f32.xlu1 %v528_v5  ;;  %532 = vadd.xlane.f32.xlu0 %v531_v6  ;;  %v590_v5 = vld [vmem:[%s1798_s1 + $0x28] sm:$0xff] }
 0x1d9   :  { %v606_v13 = vmul.f32 0.4178331, %v590_v5 }
 0x1dc   :  { %535 = vadd.xlane.f32.xlu1 %v534_v8 }
 0x249   :  { %v491_v14 = vpop.xlane.xlu0 %490 }
 0x24a   :  { %v537_v15 = vmax.f32 %v491_v14, 1e-24 }
 0x24c   :  { %1333 = vrsqrt.f32 %v537_v15 }
 0x24d   :  { %v497_v18 = vpop.xlane.xlu1 %496  ;;  %v494_v19 = vpop.xlane.xlu0 %493 }
 0x24e   :  { %v539_v20 = vmax.f32 %v497_v18, 1e-24  ;;  %v538_v21 = vmax.f32 %v494_v19, 1e-24 }
 0x250   :  { %1335 = vrsqrt.f32 %v539_v20 }
 0x251   :  { %1337 = vrsqrt.f32 %v538_v21  ;;  %v500_v23 = vpop.xlane.xlu1 %499  ;;  %v503_v25 = vpop.xlane.xlu0 %502 }
 0x252   :  { %v540_v26 = vmax.f32 %v500_v23, 1e-24  ;;  %v541_v27 = vmax.f32 %v503_v25, 1e-24 }
 0x254   :  { %1339 = vrsqrt.f32 %v540_v26 }
 0x255   :  { %1341 = vrsqrt.f32 %v541_v27  ;;  %v506_v29 = vpop.xlane.xlu1 %505  ;;  %v509_v30 = vpop.xlane.xlu0 %508 }
 0x256   :  { %v1334_v34 = vpop.eup %1333  ;;  %v542_v36 = vmax.f32 %v506_v29, 1e-24  ;;  %v543_v37 = vmax.f32 %v509_v30, 1e-24 }
 0x257   :  { %v569_v39 = vmul.f32 %v1334_v34, %v1527_v12 }
 0x258   :  { %1343 = vrsqrt.f32 %v542_v36 }
 0x259   :  { %1345 = vrsqrt.f32 %v543_v37  ;;  %v512_v43 = vpop.xlane.xlu1 %511  ;;  %v515_v44 = vpop.xlane.xlu0 %514  ;;  %v617_v45 = vadd.f32 %v601_v31, %v569_v39 }
 0x25a   :  { %v1336_v49 = vpop.eup %1335  ;;  %v544_v50 = vmax.f32 %v512_v43, 1e-24  ;;  %v545_v51 = vmax.f32 %v515_v44, 1e-24 }
 0x25b   :  { %v1338_v54 = vpop.eup %1337  ;;  %1269 = vmatprep.mubr.msk.f32.mxu0 %vm488_vm1, %v617_v45  ;;  %v571_v12 = vmul.f32 %v1336_v49, %v1535_v17  ;;  %v591_v17 = vld [vmem:[%s1798_s1 + $0x30] sm:$0xff] }
 0x25c   :  { %v570_v55 = vmul.f32 %v1338_v54, %v1524_v11  ;;  %1347 = vrsqrt.f32 %v544_v50  ;;  %v607_v14 = vmul.f32 0.4178331, %v591_v17  ;;  %v600_v17 = vld [vmem:[%s1798_s1 + $0x78] sm:$0xff] }
 0x25d   :  { %1349 = vrsqrt.f32 %v545_v51  ;;  %v518_v58 = vpop.xlane.xlu1 %517  ;;  %v521_v59 = vpop.xlane.xlu0 %520  ;;  %v619_v60 = vadd.f32 %v603_v47, %v571_v12 }
 0x25e   :  { %v1340_v63 = vpop.eup %1339  ;;  %v618_v2 = vadd.f32 %v602_v42, %v570_v55  ;;  %v546_v3 = vmax.f32 %v518_v58, 1e-24  ;;  %v547_v4 = vmax.f32 %v521_v59, 1e-24 }
 0x25f   :  { %v1342_v11 = vpop.eup %1341  ;;  %v572_v6 = vmul.f32 %v1340_v63, %v1532_v16  ;;  %v592_v16 = vld [vmem:[%s1798_s1 + $0x38] sm:$0xff] }
 0x260   :  { %1351 = vrsqrt.f32 %v546_v3  ;;  %1270 = vmatmul.mubr.msk.f32.vlgmr.msra.gmra.mrb[16].mxu0 %vm488_vm1, %v618_v2  ;;  %v573_v7 = vmul.f32 %v1342_v11, %v1546_v24  ;;  %v593_v24 = vld [vmem:[%s1798_s1 + $0x40] sm:$0xff]  ;;  %v608_v29 = vmul.f32 0.4178331, %v592_v16 }
 0x261   :  { %1353 = vrsqrt.f32 %v547_v4  ;;  %1272 = vmatprep.mubr.msk.f32.mxu0 %vm488_vm1, %v619_v60  ;;  %v524_v8 = vpop.xlane.xlu1 %523  ;;  %v527_v9 = vpop.xlane.xlu0 %526  ;;  %v620_v10 = vadd.f32 %v604_v61, %v572_v6  ;;  %v609_v30 = vmul.f32 0.4178331, %v593_v24 }
 0x262   :  { %v1344_v15 = vpop.eup %1343  ;;  %v548_v18 = vmax.f32 %v524_v8, 1e-24  ;;  %v549_v19 = vmax.f32 %v527_v9, 1e-24  ;;  %v621_v20 = vadd.f32 %v605_v62, %v573_v7  ;;  %v599_v62 = vld [vmem:[%s1798_s1 + $0x70] sm:$0xff] }
 0x263   :  { %v1346_v21 = vpop.eup %1345  ;;  %v574_v23 = vmul.f32 %v1344_v15, %v1543_v22  ;;  %v594_v22 = vld [vmem:[%s1798_s1 + $0x48] sm:$0xff]  ;;  %v615_v5 = vmul.f32 0.4178331, %v599_v62  ;;  %v616_v7 = vmul.f32 0.4178331, %v600_v17 }
 0x264   :  { %1355 = vrsqrt.f32 %v548_v18  ;;  %1273 = vmatmul.mubr.msk.f32.gmra.mrb[18].mxu0 %vm488_vm1, %v620_v10  ;;  %v575_v25 = vmul.f32 %v1346_v21, %v1560_v33  ;;  %v595_v33 = vld [vmem:[%s1798_s1 + $0x50] sm:$0xff]  ;;  %v610_v44 = vmul.f32 0.4178331, %v594_v22 }
 0x265   :  { %1357 = vrsqrt.f32 %v549_v19  ;;  %1275 = vmatprep.mubr.msk.f32.mxu0 %vm488_vm1, %v621_v20  ;;  %v530_v26 = vpop.xlane.xlu1 %529  ;;  %v533_v27 = vpop.xlane.xlu0 %532  ;;  %v622_v28 = vadd.f32 %v606_v13, %v574_v23  ;;  %v611_v50 = vmul.f32 0.4178331, %v595_v33 }
 0x266   :  { %v1348_v31 = vpop.eup %1347  ;;  %v550_v34 = vmax.f32 %v530_v26, 1e-24  ;;  %v551_v35 = vmax.f32 %v533_v27, 1e-24  ;;  %v623_v36 = vadd.f32 %v607_v14, %v575_v25 }
 0x267   :  { %v1350_v37 = vpop.eup %1349  ;;  %v576_v38 = vmul.f32 %v1348_v31, %v1557_v32  ;;  %v596_v32 = vld [vmem:[%s1798_s1 + $0x58] sm:$0xff] }
 0x268   :  { %1359 = vrsqrt.f32 %v550_v34  ;;  %1276 = vmatmul.mubr.msk.f32.gmra.mrb[20].mxu0 %vm488_vm1, %v622_v28  ;;  %v577_v39 = vmul.f32 %v1350_v37, %v1571_v41  ;;  %v597_v41 = vld [vmem:[%s1798_s1 + $0x60] sm:$0xff]  ;;  %v612_v12 = vmul.f32 0.4178331, %v596_v32 }
 0x269   :  { %1361 = vrsqrt.f32 %v551_v35  ;;  %1278 = vmatprep.mubr.msk.f32.mxu0 %vm488_vm1, %v623_v36  ;;  %v536_v42 = vpop.xlane.xlu1 %535  ;;  %v624_v43 = vadd.f32 %v608_v29, %v576_v38  ;;  %v613_v59 = vmul.f32 0.4178331, %v597_v41 }
 0x26a   :  { %v1352_v45 = vpop.eup %1351  ;;  %v552_v47 = vmax.f32 %v536_v42, 1e-24  ;;  %v625_v49 = vadd.f32 %v609_v30, %v577_v39 }
 0x26b   :  { %v1354_v51 = vpop.eup %1353  ;;  %v578_v52 = vmul.f32 %v1352_v45, %v1568_v40  ;;  %v598_v40 = vld [vmem:[%s1798_s1 + $0x68] sm:$0xff] }
 0x26c   :  { %1363 = vrsqrt.f32 %v552_v47  ;;  %1279 = vmatmul.mubr.msk.f32.gmra.mrb[22].mxu0 %vm488_vm1, %v624_v43  ;;  %v579_v53 = vmul.f32 %v1354_v51, %v1582_v48  ;;  %v614_v2 = vmul.f32 0.4178331, %v598_v40 }
 0x26d   :  { %1281 = vmatprep.mubr.msk.f32.mxu0 %vm488_vm1, %v625_v49  ;;  %v626_v54 = vadd.f32 %v610_v44, %v578_v52 }
 0x26e   :  { %v1356_v55 = vpop.eup %1355  ;;  %v627_v58 = vadd.f32 %v611_v50, %v579_v53 }
 0x26f   :  { %v1358_v60 = vpop.eup %1357  ;;  %v580_v61 = vmul.f32 %v1356_v55, %v1579_v46 }
 0x270   :  { %1282 = vmatmul.mubr.msk.f32.gmra.mrb[24].mxu0 %vm488_vm1, %v626_v54  ;;  %v581_v48 = vmul.f32 %v1358_v60, %v1596_v57 }
 0x271   :  { %1284 = vmatprep.mubr.msk.f32.mxu0 %vm488_vm1, %v627_v58  ;;  %v628_v63 = vadd.f32 %v612_v12, %v580_v61 }
 0x272   :  { %v1360_v3 = vpop.eup %1359  ;;  %v629_v4 = vadd.f32 %v613_v59, %v581_v48 }
 0x273   :  { %v1362_v46 = vpop.eup %1361  ;;  %v582_v11 = vmul.f32 %v1360_v3, %v1593_v56  ;;  %v1106_v56 = vld [vmem:[%s1799_s7] ss:$0 sm:$0xff] }
 0x274   :  { %1285 = vmatmul.mubr.msk.f32.gmra.mrb[26].mxu0 %vm488_vm1, %v628_v63  ;;  %v583_v6 = vmul.f32 %v1362_v46, %v1607_v1  ;;  %v1123_v63 = vld [vmem:[%s1800_s9] ss:$0 sm:$0xff] }
 0x275   :  { %1287 = vmatprep.mubr.msk.f32.mxu0 %vm488_vm1, %v629_v4  ;;  %v630_v57 = vadd.f32 %v614_v2, %v582_v11 }
 0x276   :  { %v1364_v8 = vpop.eup %1363  ;;  %v631_v9 = vadd.f32 %v615_v5, %v583_v6 }
 0x277   :  { %v584_v10 = vmul.f32 %v1364_v8, %v1604_v0 }
 0x278   :  { %1288 = vmatmul.mubr.msk.f32.gmra.mrb[28].mxu0 %vm488_vm1, %v630_v57 }
 0x279   :  { %1290 = vmatprep.mubr.msk.f32.mxu0 %vm488_vm1, %v631_v9  ;;  %v632_v13 = vadd.f32 %v616_v7, %v584_v10 }
 0x27c   :  { %1291 = vmatmul.mubr.msk.f32.gmra.mrb[30].mxu0 %vm488_vm1, %v632_v13 }
 0x333   :  { %v1271_v1 = vpop.f32.mrb[16].mxu0 }
 0x334   :  { %v761_v14 = vadd.f32 %v1271_v1, %v1106_v56  ;;  %v755_v15 = vpop.f32.mrb[17].mxu0 }
 0x335   :  { %v756_v18 = vadd.f32 %v1106_v56, %v755_v15 }
 0x336   :  { %v835_v16 = vmax.f32 %v761_v14, 0.0 }
 0x337   :  { %v834_v19 = vmax.f32 %v756_v18, 0.0  ;;  %v1274_v20 = vpop.f32.mrb[18].mxu0 }
 0x338   :  { %v771_v24 = vadd.f32 %v1274_v20, %v1106_v56  ;;  %v765_v0 = vpop.f32.mrb[19].mxu0 }
 0x339   :  { %v766_v21 = vadd.f32 %v1106_v56, %v765_v0  ;;  %1297 = vmatprep.mubr.msk.f32.mxu1 %vm60_vm0, %v834_v19 }
 0x33a   :  { %1298 = vmatmul.mubr.msk.f32.vlgmr.msra.gmra.mrb[16].mxu1 %vm60_vm0, %v835_v16  ;;  %v837_v26 = vmax.f32 %v771_v24, 0.0 }
 0x33b   :  { %v836_v23 = vmax.f32 %v766_v21, 0.0  ;;  %v1277_v25 = vpop.f32.mrb[20].mxu0 }
 0x33c   :  { %v781_v27 = vadd.f32 %v1277_v25, %v1106_v56  ;;  %v775_v28 = vpop.f32.mrb[21].mxu0 }
 0x33d   :  { %v776_v29 = vadd.f32 %v1106_v56, %v775_v28  ;;  %1300 = vmatprep.mubr.msk.f32.mxu1 %vm60_vm0, %v836_v23 }
 0x33e   :  { %1301 = vmatmul.mubr.msk.f32.gmra.mrb[18].mxu1 %vm60_vm0, %v837_v26  ;;  %v839_v34 = vmax.f32 %v781_v27, 0.0 }
 0x33f   :  { %v838_v30 = vmax.f32 %v776_v29, 0.0  ;;  %v1280_v31 = vpop.f32.mrb[22].mxu0 }
 0x340   :  { %v791_v35 = vadd.f32 %v1280_v31, %v1106_v56  ;;  %v785_v36 = vpop.f32.mrb[23].mxu0 }
 0x341   :  { %v786_v22 = vadd.f32 %v1106_v56, %v785_v36  ;;  %1303 = vmatprep.mubr.msk.f32.mxu1 %vm60_vm0, %v838_v30 }
 0x342   :  { %1304 = vmatmul.mubr.msk.f32.gmra.mrb[20].mxu1 %vm60_vm0, %v839_v34  ;;  %v841_v33 = vmax.f32 %v791_v35, 0.0 }
 0x343   :  { %v840_v37 = vmax.f32 %v786_v22, 0.0  ;;  %v1283_v38 = vpop.f32.mrb[24].mxu0 }
 0x344   :  { %v801_v39 = vadd.f32 %v1283_v38, %v1106_v56  ;;  %v795_v42 = vpop.f32.mrb[25].mxu0 }
 0x345   :  { %v796_v43 = vadd.f32 %v1106_v56, %v795_v42  ;;  %1306 = vmatprep.mubr.msk.f32.mxu1 %vm60_vm0, %v840_v37 }
 0x346   :  { %1307 = vmatmul.mubr.msk.f32.gmra.mrb[22].mxu1 %vm60_vm0, %v841_v33  ;;  %v843_v47 = vmax.f32 %v801_v39, 0.0 }
 0x347   :  { %v842_v44 = vmax.f32 %v796_v43, 0.0  ;;  %v1286_v45 = vpop.f32.mrb[26].mxu0 }
 0x348   :  { %v811_v49 = vadd.f32 %v1286_v45, %v1106_v56  ;;  %v805_v50 = vpop.f32.mrb[27].mxu0 }
 0x349   :  { %v806_v32 = vadd.f32 %v1106_v56, %v805_v50  ;;  %1309 = vmatprep.mubr.msk.f32.mxu1 %vm60_vm0, %v842_v44 }
 0x34a   :  { %1310 = vmatmul.mubr.msk.f32.gmra.mrb[24].mxu1 %vm60_vm0, %v843_v47  ;;  %v845_v41 = vmax.f32 %v811_v49, 0.0 }
 0x34b   :  { %v844_v51 = vmax.f32 %v806_v32, 0.0  ;;  %v1289_v52 = vpop.f32.mrb[28].mxu0 }
 0x34c   :  { %v821_v53 = vadd.f32 %v1289_v52, %v1106_v56  ;;  %v815_v54 = vpop.f32.mrb[29].mxu0 }
 0x34d   :  { %v816_v12 = vadd.f32 %v1106_v56, %v815_v54  ;;  %1312 = vmatprep.mubr.msk.f32.mxu1 %vm60_vm0, %v844_v51 }
 0x34e   :  { %1313 = vmatmul.mubr.msk.f32.gmra.mrb[26].mxu1 %vm60_vm0, %v845_v41  ;;  %v847_v59 = vmax.f32 %v821_v53, 0.0 }
 0x34f   :  { %v846_v55 = vmax.f32 %v816_v12, 0.0  ;;  %v1292_v58 = vpop.f32.mrb[30].mxu0 }
 0x350   :  { %v831_v40 = vadd.f32 %v1292_v58, %v1106_v56  ;;  %v825_v60 = vpop.f32.mrb[31].mxu0 }
 0x351   :  { %v826_v61 = vadd.f32 %v1106_v56, %v825_v60  ;;  %1315 = vmatprep.mubr.msk.f32.mxu1 %vm60_vm0, %v846_v55 }
 0x352   :  { %1316 = vmatmul.mubr.msk.f32.gmra.mrb[28].mxu1 %vm60_vm0, %v847_v59  ;;  %v849_v48 = vmax.f32 %v831_v40, 0.0 }
 0x353   :  { %v848_v62 = vmax.f32 %v826_v61, 0.0 }
 0x355   :  { %1318 = vmatprep.mubr.msk.f32.mxu1 %vm60_vm0, %v848_v62 }
 0x356   :  { %1319 = vmatmul.mubr.msk.f32.gmra.mrb[30].mxu1 %vm60_vm0, %v849_v48 }
 0x40d   :  { %v1299_v2 = vpop.f32.mrb[16].mxu1 }
 0x40e   :  { %v979_v3 = vadd.f32 %v1299_v2, %v1123_v63  ;;  %v973_v4 = vpop.f32.mrb[17].mxu1 }
 0x40f   :  { %v974_v5 = vadd.f32 %v1123_v63, %v973_v4 }
 0x410   :  { %1053 = vst.msk [vmem:[%s1801_s10 + $0x8] sm:$0xff] %vm60_vm0, %v979_v3 }
 0x411   :  { %1052 = vst.msk [vmem:[%s1801_s10] sm:$0xff] %vm60_vm0, %v974_v5  ;;  %v1302_v17 = vpop.f32.mrb[18].mxu1 }
 0x412   :  { %v989_v46 = vadd.f32 %v1302_v17, %v1123_v63  ;;  %v983_v11 = vpop.f32.mrb[19].mxu1 }
 0x413   :  { %v984_v6 = vadd.f32 %v1123_v63, %v983_v11 }
 0x414   :  { %1055 = vst.msk [vmem:[%s1801_s10 + $0x18] sm:$0xff] %vm60_vm0, %v989_v46 }
 0x415   :  { %1054 = vst.msk [vmem:[%s1801_s10 + $0x10] sm:$0xff] %vm60_vm0, %v984_v6  ;;  %v1305_v57 = vpop.f32.mrb[20].mxu1 }
 0x416   :  { %v999_v7 = vadd.f32 %v1305_v57, %v1123_v63  ;;  %v993_v8 = vpop.f32.mrb[21].mxu1 }
 0x417   :  { %v994_v9 = vadd.f32 %v1123_v63, %v993_v8 }
 0x418   :  { %1057 = vst.msk [vmem:[%s1801_s10 + $0x28] sm:$0xff] %vm60_vm0, %v999_v7 }
 0x419   :  { %1056 = vst.msk [vmem:[%s1801_s10 + $0x20] sm:$0xff] %vm60_vm0, %v994_v9  ;;  %v1308_v10 = vpop.f32.mrb[22].mxu1 }
 0x41a   :  { %v1009_v13 = vadd.f32 %v1308_v10, %v1123_v63  ;;  %v1003_v56 = vpop.f32.mrb[23].mxu1 }
 0x41b   :  { %v1004_v1 = vadd.f32 %v1123_v63, %v1003_v56 }
 0x41c   :  { %1059 = vst.msk [vmem:[%s1801_s10 + $0x38] sm:$0xff] %vm60_vm0, %v1009_v13 }
 0x41d   :  { %1058 = vst.msk [vmem:[%s1801_s10 + $0x30] sm:$0xff] %vm60_vm0, %v1004_v1  ;;  %v1311_v14 = vpop.f32.mrb[24].mxu1 }
 0x41e   :  { %v1019_v15 = vadd.f32 %v1311_v14, %v1123_v63  ;;  %v1013_v18 = vpop.f32.mrb[25].mxu1 }
 0x41f   :  { %v1014_v19 = vadd.f32 %v1123_v63, %v1013_v18 }
 0x420   :  { %1061 = vst.msk [vmem:[%s1801_s10 + $0x48] sm:$0xff] %vm60_vm0, %v1019_v15 }
 0x421   :  { %1060 = vst.msk [vmem:[%s1801_s10 + $0x40] sm:$0xff] %vm60_vm0, %v1014_v19  ;;  %v1314_v20 = vpop.f32.mrb[26].mxu1 }
 0x422   :  { %v1029_v16 = vadd.f32 %v1314_v20, %v1123_v63  ;;  %v1023_v24 = vpop.f32.mrb[27].mxu1 }
 0x423   :  { %v1024_v0 = vadd.f32 %v1123_v63, %v1023_v24 }
 0x424   :  { %1063 = vst.msk [vmem:[%s1801_s10 + $0x58] sm:$0xff] %vm60_vm0, %v1029_v16 }
 0x425   :  { %1062 = vst.msk [vmem:[%s1801_s10 + $0x50] sm:$0xff] %vm60_vm0, %v1024_v0  ;;  %v1317_v21 = vpop.f32.mrb[28].mxu1 }
 0x426   :  { %v1039_v23 = vadd.f32 %v1317_v21, %v1123_v63  ;;  %v1033_v25 = vpop.f32.mrb[29].mxu1 }
 0x427   :  { %v1034_v26 = vadd.f32 %v1123_v63, %v1033_v25 }
 0x428   :  { %1065 = vst.msk [vmem:[%s1801_s10 + $0x68] sm:$0xff] %vm60_vm0, %v1039_v23 }
 0x429   :  { %1064 = vst.msk [vmem:[%s1801_s10 + $0x60] sm:$0xff] %vm60_vm0, %v1034_v26  ;;  %v1320_v27 = vpop.f32.mrb[30].mxu1 }
 0x42a   :  { %v1049_v28 = vadd.f32 %v1320_v27, %v1123_v63  ;;  %v1043_v29 = vpop.f32.mrb[31].mxu1 }
 0x42b   :  { %v1044_v30 = vadd.f32 %v1123_v63, %v1043_v29 }
 0x42c   :  { %1067 = vst.msk [vmem:[%s1801_s10 + $0x78] sm:$0xff] %vm60_vm0, %v1049_v28 }
 0x42d   :  { %1066 = vst.msk [vmem:[%s1801_s10 + $0x70] sm:$0xff] %vm60_vm0, %v1044_v30 }

</bundles_post_ra>
